<compile_context>
chip_gen: v6e
topology: v6e:2x2x1
jax: 0.10.0
libtpu: 0.0.40
codegen_flags: <defaults>
</compile_context>

<pallas_src>
import functools

import jax
import jax.numpy as jnp
from jax.experimental import pallas as pl
from jax.experimental.pallas import tpu as pltpu

F_PAD = 8            # feature dims (5/6/3) padded to one full 8-sublane tile
_IN, _HID, _MID = 5, 6, 3


# ----------------------------------------------------------------------------
# Pallas kernels. All operands are pre-padded to 8 rows and pre-transposed to
# [out_features, in_features]; activations are [8, TB] (batch on lanes).
# ----------------------------------------------------------------------------
def _fwd_main_kernel(x_ref, w0_ref, b0_ref, w1_ref, o_ref):
    z = jnp.dot(w0_ref[...], x_ref[...], preferred_element_type=jnp.float32)
    z = jnp.maximum(z + b0_ref[...], 0.0)                      # layer0 + ReLU
    y = jnp.dot(w1_ref[...], z, preferred_element_type=jnp.float32)
    o_ref[...] = jnp.maximum(y, 0.0).astype(o_ref.dtype)       # layer1 + ReLU


def _fwd_alt_kernel(x_ref, w0_ref, b0_ref, w2a_ref, w2b_ref, o_ref):
    z = jnp.dot(w0_ref[...], x_ref[...], preferred_element_type=jnp.float32)
    z = jnp.maximum(z + b0_ref[...], 0.0)                      # layer0 + ReLU
    h = jnp.maximum(
        jnp.dot(w2a_ref[...], z, preferred_element_type=jnp.float32), 0.0)
    y = jnp.dot(w2b_ref[...], h, preferred_element_type=jnp.float32)
    o_ref[...] = jnp.maximum(y, 0.0).astype(o_ref.dtype)       # layer2 + ReLU


def _fwd_both_kernel(x_ref, w0_ref, b0_ref, w1_ref, w2a_ref, w2b_ref,
                     om_ref, oa_ref):
    # Fused variant: both paths share the layer0 result; one pallas_call,
    # two lane-dense outputs.
    z = jnp.dot(w0_ref[...], x_ref[...], preferred_element_type=jnp.float32)
    z = jnp.maximum(z + b0_ref[...], 0.0)
    ym = jnp.dot(w1_ref[...], z, preferred_element_type=jnp.float32)
    om_ref[...] = jnp.maximum(ym, 0.0).astype(om_ref.dtype)
    h = jnp.maximum(
        jnp.dot(w2a_ref[...], z, preferred_element_type=jnp.float32), 0.0)
    ya = jnp.dot(w2b_ref[...], h, preferred_element_type=jnp.float32)
    oa_ref[...] = jnp.maximum(ya, 0.0).astype(oa_ref.dtype)


# ----------------------------------------------------------------------------
# Tiling / pallas_call plumbing
# ----------------------------------------------------------------------------
def _pick_tile(batch, block_b):
    """Pick (TB lanes, padded batch).

    Mem-bound kernel: take the biggest lane tile that fits scoped VMEM, but
    keep >= 2 grid steps for batches > 256 so dimension_semantics=("parallel",)
    can shard the grid across v7x's two TensorCores. Tiny batches use a single
    full-extent step (legal via the full-array-dim exception)."""
    if batch <= 256:
        return batch, batch
    half = pl.cdiv(pl.cdiv(batch, 2), 128) * 128     # lane-aligned half batch
    tb = max(128, min(block_b, half))
    bp = pl.cdiv(batch, tb) * tb
    return tb, bp


def _call(kernel, x_fb, weights, tb, bp, n_out):
    grid = (bp // tb,)
    act_spec = pl.BlockSpec((F_PAD, tb), lambda i: (0, i))

    def const_spec(shape):
        # Full-array block, constant index_map -> VMEM-resident across grid.
        return pl.BlockSpec(shape, lambda i: (0, 0))

    in_specs = [act_spec] + [const_spec(w.shape) for w in weights]
    out_shape = jax.ShapeDtypeStruct((F_PAD, bp), x_fb.dtype)
    out_specs = act_spec
    if n_out > 1:
        out_shape = (out_shape,) * n_out
        out_specs = (act_spec,) * n_out

    return pl.pallas_call(
        kernel,
        out_shape=out_shape,
        grid=grid,
        in_specs=in_specs,
        out_specs=out_specs,
        compiler_params=pltpu.CompilerParams(
            dimension_semantics=("parallel",)),
    )(x_fb, *weights)


# ----------------------------------------------------------------------------
# Parameter packing (done once, outside the hot path)
# ----------------------------------------------------------------------------
def pack_params(params):
    """Pad/transpose weights to [8, 8] (and bias to [8, 1]) once."""
    dt = params["w0"].dtype
    zero = lambda: jnp.zeros((F_PAD, F_PAD), dt)
    return {
        "w0p": zero().at[:_HID, :_IN].set(params["w0"].T),    # [out=6,in=5] padded
        "b0p": jnp.zeros((F_PAD, 1), dt).at[:_HID, 0].set(params["b0"][0]),
        "w1p": zero().at[:_HID, :_HID].set(params["w1"].T),
        "w2ap": zero().at[:_MID, :_HID].set(params["w2a"].T),
        "w2bp": zero().at[:_HID, :_MID].set(params["w2b"].T),
    }


# ----------------------------------------------------------------------------
# Forward entry points
# ----------------------------------------------------------------------------
@functools.partial(jax.jit, static_argnames=("use_alt_path", "block_b"))
def model_forward_fb(x_fb, packed, use_alt_path=False, block_b=65536):
    """Hot path: x_fb is already in the padded [8, B] batch-on-lanes layout
    (rows 5..7 zero). No wrapper-side activation passes; returns [8, B]
    (rows 6..7 are guaranteed zero)."""
    fdim, batch = x_fb.shape
    assert fdim == F_PAD
    tb, bp = _pick_tile(batch, block_b)
    if bp != batch:
        x_fb = jnp.pad(x_fb, ((0, 0), (0, bp - batch)))
    if use_alt_path:
        out = _call(_fwd_alt_kernel, x_fb,
                    (packed["w0p"], packed["b0p"], packed["w2ap"], packed["w2bp"]),
                    tb, bp, 1)
    else:
        out = _call(_fwd_main_kernel, x_fb,
                    (packed["w0p"], packed["b0p"], packed["w1p"]),
                    tb, bp, 1)
    return out if bp == batch else out[:, :batch]


@functools.partial(jax.jit, static_argnames=("use_alt_path", "block_b"))
def model_forward(x, packed, use_alt_path=False, block_b=65536):
    """Module-interface wrapper: x [B, 5] -> out [B, 6] (one path per call,
    like the PyTorch module). The single pad+transpose here is the only extra
    HBM pass; prefer model_forward_fb to keep activations in [F, B] layout."""
    batch, in_f = x.shape
    tb, bp = _pick_tile(batch, block_b)
    x_fb = jnp.zeros((F_PAD, bp), x.dtype).at[:in_f, :batch].set(x.T)
    if use_alt_path:
        out_fb = _call(_fwd_alt_kernel, x_fb,
                       (packed["w0p"], packed["b0p"], packed["w2ap"], packed["w2bp"]),
                       tb, bp, 1)
    else:
        out_fb = _call(_fwd_main_kernel, x_fb,
                       (packed["w0p"], packed["b0p"], packed["w1p"]),
                       tb, bp, 1)
    return out_fb[:_HID, :batch].T


@functools.partial(jax.jit, static_argnames=("block_b",))
def model_forward_both(x, packed, block_b=32768):
    """Fused variant computing BOTH paths from one pallas_call (shared layer0).
    Smaller default tile (3 pipelined activation blocks instead of 2) to stay
    under v5e's 16 MiB scoped-VMEM default."""
    batch, in_f = x.shape
    tb, bp = _pick_tile(batch, block_b)
    x_fb = jnp.zeros((F_PAD, bp), x.dtype).at[:in_f, :batch].set(x.T)
    om, oa = _call(_fwd_both_kernel, x_fb,
                   (packed["w0p"], packed["b0p"], packed["w1p"],
                    packed["w2ap"], packed["w2bp"]),
                   tb, bp, 2)
    return om[:_HID, :batch].T, oa[:_HID, :batch].T


# ----------------------------------------------------------------------------
# Params / reference
# ----------------------------------------------------------------------------
def init_params(key, dtype=jnp.float32):
    """Deterministic init mimicking PyTorch Linear default (+-1/sqrt(fan_in))."""
    k0w, k0b, k1, k2a, k2b = jax.random.split(key, 5)

    def u(k, shape, fan_in):
        bound = 1.0 / jnp.sqrt(float(fan_in))
        return jax.random.uniform(k, shape, dtype=dtype, minval=-bound, maxval=bound)

    return {
        "w0": u(k0w, (5, 6), 5),   # layer0 weight, stored [in, out]
        "b0": u(k0b, (1, 6), 5),   # layer0 bias
        "w1": u(k1, (6, 6), 6),    # layer1 weight (bias=False)
        "w2a": u(k2a, (6, 3), 6),  # layer2[0] weight (bias=False)
        "w2b": u(k2b, (3, 6), 3),  # layer2[2] weight (bias=False)
    }


def _reference_forward(x, params, use_alt_path=False):
    z = jnp.maximum(x @ params["w0"] + params["b0"], 0.0)
    if use_alt_path:
        h = jnp.maximum(z @ params["w2a"], 0.0)
        return jnp.maximum(h @ params["w2b"], 0.0)
    return jnp.maximum(z @ params["w1"], 0.0)


# TODO(synk): FSDP wrapping, sharding-strategy checks, and the backward /
# flip_path (requires_grad) training logic are distributed-training plumbing
# with no forward-compute Pallas equivalent; only the forward math is kernelized.

if __name__ == "__main__":
    key = jax.random.PRNGKey(0)
    kx, kp, kx2 = jax.random.split(key, 3)
    params = init_params(kp)
    packed = pack_params(params)

    # Module's get_input(): torch.randn((8, 5)).
    x = jax.random.normal(kx, (8, 5), dtype=jnp.float32)

    out_main = jax.block_until_ready(model_forward(x, packed, use_alt_path=False))
    out_alt = jax.block_until_ready(model_forward(x, packed, use_alt_path=True))

    ref_main = _reference_forward(x, params, use_alt_path=False)
    ref_alt = _reference_forward(x, params, use_alt_path=True)
    assert out_main.shape == (8, 6) and out_alt.shape == (8, 6)
    assert jnp.allclose(out_main, ref_main, atol=1e-5, rtol=1e-5)
    assert jnp.allclose(out_alt, ref_alt, atol=1e-5, rtol=1e-5)

    # Exercise the multi-step batch grid (grid=(2,), both TCs on v7x engage),
    # padded-batch slicing, and the fused dual-path kernel.
    xb = jax.random.normal(kx2, (384, 5), dtype=jnp.float32)
    fm, fa = jax.block_until_ready(model_forward_both(xb, packed))
    assert jnp.allclose(fm, _reference_forward(xb, params, False), atol=1e-4, rtol=1e-4)
    assert jnp.allclose(fa, _reference_forward(xb, params, True), atol=1e-4, rtol=1e-4)

    # Exercise the zero-wrapper-traffic [F, B] entry point.
    xb_fb = jnp.zeros((F_PAD, xb.shape[0]), xb.dtype).at[:_IN, :].set(xb.T)
    out_fb = jax.block_until_ready(model_forward_fb(xb_fb, packed))
    assert out_fb.shape == (F_PAD, xb.shape[0])
    assert jnp.allclose(out_fb[:_HID].T, _reference_forward(xb, params, False),
                        atol=1e-4, rtol=1e-4)

    print("KERNEL_OK")
</pallas_src>

<mosaic_0001>
module attributes {stable_mosaic.version = 11 : i64} {
  func.func @_fwd_main_kernel(%arg0: i32, %arg1: memref<8x8xf32, #tpu.memory_space<vmem>>, %arg2: memref<8x8xf32, #tpu.memory_space<vmem>>, %arg3: memref<8x1xf32, #tpu.memory_space<vmem>>, %arg4: memref<8x8xf32, #tpu.memory_space<vmem>>, %arg5: memref<8x8xf32, #tpu.memory_space<vmem>>) attributes {dimension_semantics = [#tpu.dimension_semantics<parallel>], iteration_bounds = array<i64: 1>, scalar_prefetch = 0 : i64, scratch_operands = 0 : i64, tpu.core_type = #tpu.core_type<tc>, window_params = [{transform_indices = @transform_0, window_bounds = array<i64: 8, 8>}, {pipeline_mode = #tpu.pipeline_mode<synchronous>, transform_indices = @transform_1, window_bounds = array<i64: 8, 8>}, {pipeline_mode = #tpu.pipeline_mode<synchronous>, transform_indices = @transform_2, window_bounds = array<i64: 8, 1>}, {pipeline_mode = #tpu.pipeline_mode<synchronous>, transform_indices = @transform_3, window_bounds = array<i64: 8, 8>}, {transform_indices = @transform_4, window_bounds = array<i64: 8, 8>}]} {
    %c0 = arith.constant 0 : index
    %c0_0 = arith.constant 0 : index
    %0 = vector.load %arg2[%c0, %c0_0] : memref<8x8xf32, #tpu.memory_space<vmem>>, vector<8x8xf32>
    %c0_1 = arith.constant 0 : index
    %c0_2 = arith.constant 0 : index
    %1 = vector.load %arg1[%c0_1, %c0_2] : memref<8x8xf32, #tpu.memory_space<vmem>>, vector<8x8xf32>
    %cst = arith.constant dense<0.000000e+00> : vector<8x8xf32>
    %2 = tpu.matmul %0, %1, %cst {dimension_numbers = #tpu.dot_dimension_numbers<[1], [0], [0], [1], [0, 0, 1, 1], [], []>} : vector<8x8xf32>, vector<8x8xf32>, vector<8x8xf32> -> vector<8x8xf32>
    %c0_3 = arith.constant 0 : index
    %c0_4 = arith.constant 0 : index
    %3 = vector.load %arg3[%c0_3, %c0_4] : memref<8x1xf32, #tpu.memory_space<vmem>>, vector<8x1xf32>
    %4 = vector.broadcast %3 : vector<8x1xf32> to vector<8x8xf32>
    %5 = arith.addf %2, %4 : vector<8x8xf32>
    %cst_5 = arith.constant 0.000000e+00 : f32
    %6 = vector.broadcast %cst_5 : f32 to vector<8x8xf32>
    %7 = arith.maximumf %5, %6 : vector<8x8xf32>
    %c0_6 = arith.constant 0 : index
    %c0_7 = arith.constant 0 : index
    %8 = vector.load %arg4[%c0_6, %c0_7] : memref<8x8xf32, #tpu.memory_space<vmem>>, vector<8x8xf32>
    %cst_8 = arith.constant dense<0.000000e+00> : vector<8x8xf32>
    %9 = tpu.matmul %8, %7, %cst_8 {dimension_numbers = #tpu.dot_dimension_numbers<[1], [0], [0], [1], [0, 0, 1, 1], [], []>} : vector<8x8xf32>, vector<8x8xf32>, vector<8x8xf32> -> vector<8x8xf32>
    %cst_9 = arith.constant 0.000000e+00 : f32
    %10 = vector.broadcast %cst_9 : f32 to vector<8x8xf32>
    %11 = arith.maximumf %9, %10 : vector<8x8xf32>
    %c0_10 = arith.constant 0 : index
    %c0_11 = arith.constant 0 : index
    %12 = vector.load %arg5[%c0_10, %c0_11] : memref<8x8xf32, #tpu.memory_space<vmem>>, vector<8x8xf32>
    tpu.vector_store %arg5[%c0_10, %c0_11], %11 {strides = array<i32>} : memref<8x8xf32, #tpu.memory_space<vmem>>, vector<8x8xf32>,
    return
  }
  func.func @transform_0(%arg0: i32) -> (i32, i32) {
    %c0_i32 = arith.constant 0 : i32
    %c0_i32_0 = arith.constant 0 : i32
    return %c0_i32, %arg0 : i32, i32
  }
  func.func @transform_1(%arg0: i32) -> (i32, i32) {
    %c0_i32 = arith.constant 0 : i32
    %c0_i32_0 = arith.constant 0 : i32
    %c0_i32_1 = arith.constant 0 : i32
    return %c0_i32, %c0_i32_0 : i32, i32
  }
  func.func @transform_2(%arg0: i32) -> (i32, i32) {
    %c0_i32 = arith.constant 0 : i32
    %c0_i32_0 = arith.constant 0 : i32
    %c0_i32_1 = arith.constant 0 : i32
    return %c0_i32, %c0_i32_0 : i32, i32
  }
  func.func @transform_3(%arg0: i32) -> (i32, i32) {
    %c0_i32 = arith.constant 0 : i32
    %c0_i32_0 = arith.constant 0 : i32
    %c0_i32_1 = arith.constant 0 : i32
    return %c0_i32, %c0_i32_0 : i32, i32
  }
  func.func @transform_4(%arg0: i32) -> (i32, i32) {
    %c0_i32 = arith.constant 0 : i32
    %c0_i32_0 = arith.constant 0 : i32
    return %c0_i32, %arg0 : i32, i32
  }
}

</mosaic_0001>

<bundles_post_ra>
// kernel: model_forward.1
= control target key start
LH: loop header
LB: loop body
LE: loop exit
PB: predicated region body
PF: predicated region fallthrough
CT: control target
= control target key end

     0   :  { %vm25_vm0 = vcmask 64512   ;;  %v200_v0 = vmov 0.0   ;;  %vm201_vm1 = vmmov 0   ;;  %v202_v4 = vmov 0   ;;  %s246_s0 = inlined_call_operand.vmem [shape: f32[8,8], index: 0, kind: input, shape index: {}]   ;;  %s247_s1 = inlined_call_operand.vmem [shape: f32[8,8], index: 1, kind: input, shape index: {}]   ;;  %s248_s2 = inlined_call_operand.vmem [shape: f32[8,1], index: 2, kind: input, shape index: {}]   ;;  %s249_s3 = inlined_call_operand.vmem [shape: f32[8,8], index: 3, kind: input, shape index: {}]   ;;  %s250_s4 = inlined_call_operand.vmem [shape: f32[8,8], index: 4, kind: output, shape index: {}]  }
   0x1   :  { %186 = vmatprep.subr.mxu0 %v200_v0  ;;  %v18_v1 = vld [vmem:[%s246_s0] sm:$0xff]  ;;  %188 = vmatprep.mubr.msk.f32.mxu0 %vm201_vm1, %v200_v0 }
   0x2   :  { %v17_v2 = vld [vmem:[%s247_s1] sm:$0xff]  ;;  %187 = vmatpush3.msra.mxu0 %v18_v1  ;;  %199 = vset.pattern.permute.xlu0 %v202_v4 }
   0x3   :  { %v19_v3 = vld [vmem:[%s248_s2] sm:$0xff]  ;;  %189 = vmatmul.mubr.msk.f32.vlgmr.msra.gmra.mxu0 %vm25_vm0, %v17_v2  ;;  %191 = vmatprep.subr.mxu1 %v200_v0 }
   0x4   :  { %22 = vperm.xlu0 %199, %v19_v3   ;;  %193 = vmatprep.mubr.msk.f32.mxu1 %vm201_vm1, %v200_v0  ;;  %v100_v10 = vld [vmem:[%s249_s3] sm:$0xff] }
  0x7f   :  { %v23_v5 = vpop.permute.xlu0 %22 }
  0xc3   :  { %v95_v6 = vpop.f32.mrf.mxu0 }
  0xc4   :  { %v96_v7 = vadd.f32 %v95_v6, %v23_v5 }
  0xc5   :  { %v190_v8 = vpop.f32.mrf.mxu0 }
  0xc6   :  { %v99_v9 = vmax.f32 %v96_v7, 0.0 }
  0xc8   :  { %192 = vmatpush3.msra.mxu1 %v99_v9 }
  0xc9   :  { %194 = vmatmul.mubr.msk.f32.vlgmr.msra.gmra.mxu1 %vm25_vm0, %v100_v10 }
 0x189   :  { %v170_v11 = vpop.f32.mrf.mxu1 }
 0x18a   :  { %v174_v12 = vmax.f32 %v170_v11, 0.0 }
 0x18b   :  { %v195_v13 = vpop.f32.mrf.mxu1 }
 0x18c   :  { %175 = vst.msk [vmem:[%s250_s4] sm:$0xff] %vm25_vm0, %v174_v12 }

</bundles_post_ra>
